<compile_context>
chip_gen: v5e
topology: v5e:2x2
jax: 0.10.0
libtpu: 0.0.40
codegen_flags: <defaults>
</compile_context>

<pallas_src>
import math
from functools import partial

import jax
import jax.numpy as jnp
from jax import lax
from jax.experimental import pallas as pl
from jax.experimental.pallas import tpu as pltpu


def attention_kernel(x_ref, wqkv_ref, wp_ref, bp_ref, o_ref,
                     qkv_ref, heads_ref, *, num_heads):
    """Grid = (B, num_q_tiles). One step = one (batch, query-tile) pair.

    x_ref    : (1, N, C)   bf16 full-sequence batch tile (const over q tiles)
    wqkv_ref : (C, 3C)     bf16 fused qkv weight (x @ Wqkv.T layout, q scaled)
    wp_ref   : (C, C)      bf16 output projection weight (x @ Wp.T layout)
    bp_ref   : (1, C)      f32 projection bias
    o_ref    : (1, TQ, C)  output tile for this query tile
    qkv_ref  : (N, 3C)     bf16 VMEM scratch, fused QKV of the whole sequence
                           (computed once per batch at q-tile 0, reused across
                           q tiles -> the q-tile grid axis must be "arbitrary")
    heads_ref: (TQ, C)     bf16 VMEM scratch, concatenated head outputs
    """
    qt = pl.program_id(1)

    N = x_ref.shape[1]
    C = x_ref.shape[2]
    TQ = o_ref.shape[1]
    hd = C // num_heads

    # Fused QKV projection for the full sequence, once per batch.
    # Output width = 3C lanes -> full MXU column utilization.
    @pl.when(qt == 0)
    def _compute_qkv():
        x = x_ref[0]                                               # (N, C) bf16
        qkv_ref[...] = jnp.dot(
            x, wqkv_ref[...],
            preferred_element_type=jnp.float32).astype(jnp.bfloat16)

    row_start = pl.multiple_of(qt * TQ, TQ)
    q_rows = pl.ds(row_start, TQ)

    # Per-head attention core on lane slices of the fused QKV scratch.
    # num_heads is small and static -> unrolled at trace time.
    for h in range(num_heads):
        qh = qkv_ref[q_rows, pl.ds(0 * C + h * hd, hd)]            # (TQ, hd) bf16 (scaled)
        kh = qkv_ref[:, pl.ds(1 * C + h * hd, hd)]                 # (N,  hd) bf16
        vh = qkv_ref[:, pl.ds(2 * C + h * hd, hd)]                 # (N,  hd) bf16

        # NT-form QK^T: contract over head_dim of both operands (no explicit
        # kh transpose materialized).
        s = lax.dot_general(qh, kh,
                            dimension_numbers=(((1,), (1,)), ((), ())),
                            preferred_element_type=jnp.float32)    # (TQ, N) f32

        # Numerically stable softmax; normalization deferred past PV.
        m = jnp.max(s, axis=-1, keepdims=True)
        p = jnp.exp(s - m)                                         # (TQ, N) f32
        row_sum = jnp.sum(p, axis=-1, keepdims=True)               # (TQ, 1) f32

        pv = jnp.dot(p.astype(jnp.bfloat16), vh,
                     preferred_element_type=jnp.float32)           # (TQ, hd) f32
        oh = pv * pl.reciprocal(row_sum, approx=True)              # (TQ, hd) f32

        heads_ref[:, pl.ds(h * hd, hd)] = oh.astype(jnp.bfloat16)

    # Fused output projection: (TQ, C) x (C, C) + bias, one full-width matmul.
    out = jnp.dot(heads_ref[...], wp_ref[...],
                  preferred_element_type=jnp.float32)              # (TQ, C) f32
    o_ref[0] = (out + bp_ref[...]).astype(o_ref.dtype)


def prepare_attention_params(w_qkv, w_proj, b_proj, num_heads):
    """One-time (init-time) weight repacking -- hoisted out of the hot path.

    w_qkv  : (3C, C)  PyTorch nn.Linear layout (rows = out features)
    w_proj : (C, C)
    b_proj : (C,)
    Returns (w_qkv_t, w_proj_t, bias) ready for the kernel.
    """
    three_c, C = w_qkv.shape
    hd = C // num_heads
    scale = hd ** (-0.5)

    # y = x @ W.T  ->  store W.T; fold the q scale into the q output columns.
    w_qkv_t = jnp.transpose(w_qkv)                                 # (C, 3C)
    col_scale = jnp.concatenate(
        [jnp.full((C,), scale, dtype=w_qkv_t.dtype),
         jnp.ones((2 * C,), dtype=w_qkv_t.dtype)])
    w_qkv_t = (w_qkv_t * col_scale[None, :]).astype(jnp.bfloat16)  # (C, 3C)

    w_proj_t = jnp.transpose(w_proj).astype(jnp.bfloat16)          # (C, C)
    bias = b_proj.reshape(1, C).astype(jnp.float32)                # (1, C)
    return w_qkv_t, w_proj_t, bias


def _pick_q_tile(N, max_tile=256):
    """Largest query tile <= max_tile that divides N (multiple of 8 if tiled)."""
    if N <= max_tile:
        return N
    for t in range(max_tile, 7, -8):
        if N % t == 0:
            return t
    return N


def attention_forward(x, params, num_heads, q_tile=None):
    """Pallas-backed forward of the Attention module.

    x      : (B, N, C)
    params : output of prepare_attention_params
    """
    w_qkv_t, w_proj_t, bias = params
    B, N, C = x.shape
    out_dtype = x.dtype
    out_bytes = jnp.dtype(out_dtype).itemsize

    TQ = q_tile if q_tile is not None else _pick_q_tile(N)
    num_q_tiles = N // TQ

    x_bf = x.astype(jnp.bfloat16)

    # Working-set-derived VMEM budget (double buffers + scratch + softmax tmp).
    vmem_bytes = (
        2 * (N * C * 2)             # x tile, bf16, double buffered
        + 2 * (C * 3 * C * 2)       # fused qkv weight
        + 2 * (C * C * 2)           # proj weight
        + 2 * (C * 4)               # bias
        + 2 * (TQ * C * out_bytes)  # output tile
        + N * 3 * C * 2             # qkv scratch (bf16)
        + TQ * C * 2                # head-concat scratch (bf16)
        + 4 * (TQ * N * 4)          # f32 softmax temporaries (s, p, ...)
        + (8 << 20)                 # compiler-internal headroom
    )
    vmem_limit = max(32 << 20, min(int(vmem_bytes), 100 << 20))

    return pl.pallas_call(
        partial(attention_kernel, num_heads=num_heads),
        out_shape=jax.ShapeDtypeStruct((B, N, C), out_dtype),
        grid=(B, num_q_tiles),                        # batch outer, q-tile inner
        in_specs=[
            pl.BlockSpec((1, N, C), lambda b, qt: (b, 0, 0)),      # x (const over qt)
            pl.BlockSpec((C, 3 * C), lambda b, qt: (0, 0)),        # fused Wqkv^T (q scaled)
            pl.BlockSpec((C, C), lambda b, qt: (0, 0)),            # Wproj^T
            pl.BlockSpec((1, C), lambda b, qt: (0, 0)),            # bias
        ],
        out_specs=pl.BlockSpec((1, TQ, C), lambda b, qt: (b, qt, 0)),
        scratch_shapes=[
            pltpu.VMEM((N, 3 * C), jnp.bfloat16),     # fused QKV, persists across qt
            pltpu.VMEM((TQ, C), jnp.bfloat16),        # concatenated head outputs
        ],
        # q-tile axis is "arbitrary" because the QKV scratch is carried across
        # it; batch axis is "parallel" for megacore sharding.
        compiler_params=pltpu.CompilerParams(
            dimension_semantics=("parallel", "arbitrary"),
            vmem_limit_bytes=vmem_limit),
    )(x_bf, w_qkv_t, w_proj_t, bias)


def attention_reference(x, w_qkv, w_proj, b_proj, num_heads):
    """Pure-JAX f32 mirror of the PyTorch forward (for verification)."""
    B, N, C = x.shape
    head_dim = C // num_heads
    scale = head_dim ** (-0.5)
    qkv = jnp.einsum('bnc,oc->bno', x, w_qkv)               # (B, N, 3C)
    qkv = qkv.reshape(B, N, 3, num_heads, head_dim)
    qkv = jnp.transpose(qkv, (2, 0, 3, 1, 4))               # (3, B, H, N, hd)
    q, k, v = qkv[0], qkv[1], qkv[2]
    q = q * scale
    attn = jnp.einsum('bhqd,bhkd->bhqk', q, k)
    attn = jax.nn.softmax(attn, axis=-1)
    out = jnp.einsum('bhqk,bhkd->bhqd', attn, v)
    out = jnp.transpose(out, (0, 2, 1, 3)).reshape(B, N, C)
    out = jnp.einsum('bnc,oc->bno', out, w_proj) + b_proj
    return out


if __name__ == "__main__":
    # Small smoke-test shapes; C is a multiple of 128 so the fused GEMMs and
    # output stores stay lane-dense (hd=64 matches typical ViT head width).
    B, N, C = 2, 16, 128
    num_heads = 2

    key = jax.random.PRNGKey(0)
    kx, kqkv, kproj, kbias = jax.random.split(key, 4)

    x = jax.random.normal(kx, (B, N, C), dtype=jnp.float32)
    w_qkv = jax.random.normal(kqkv, (3 * C, C), dtype=jnp.float32) * (1.0 / math.sqrt(C))
    w_proj = jax.random.normal(kproj, (C, C), dtype=jnp.float32) * (1.0 / math.sqrt(C))
    b_proj = jax.random.normal(kbias, (C,), dtype=jnp.float32) * 0.01

    # One-time weight repacking (hoisted out of the per-call hot path).
    params = prepare_attention_params(w_qkv, w_proj, b_proj, num_heads)
    params = jax.tree_util.tree_map(jax.block_until_ready, params)

    out = attention_forward(x, params, num_heads)
    out = jax.block_until_ready(out)

    ref = attention_reference(x, w_qkv, w_proj, b_proj, num_heads)
    assert out.shape == (B, N, C)
    # bf16 GEMMs (f32 accumulation) + approx reciprocal => loose tolerance.
    assert jnp.allclose(out, ref, atol=5e-2, rtol=5e-2), \
        f"mismatch vs reference, max abs diff {jnp.max(jnp.abs(out - ref))}"

    print("KERNEL_OK")
</pallas_src>

<mosaic_0001>
module attributes {stable_mosaic.version = 11 : i64} {
  func.func @attention_kernel(%arg0: i32, %arg1: i32, %arg2: memref<1x16x128xbf16, #tpu.memory_space<vmem>>, %arg3: memref<128x384xbf16, #tpu.memory_space<vmem>>, %arg4: memref<128x128xbf16, #tpu.memory_space<vmem>>, %arg5: memref<1x128xf32, #tpu.memory_space<vmem>>, %arg6: memref<1x16x128xf32, #tpu.memory_space<vmem>>, %arg7: memref<16x384xbf16, #tpu.memory_space<vmem>>, %arg8: memref<16x128xbf16, #tpu.memory_space<vmem>>) attributes {dimension_semantics = [#tpu.dimension_semantics<parallel>, #tpu.dimension_semantics<arbitrary>], iteration_bounds = array<i64: 2, 1>, scalar_prefetch = 0 : i64, scratch_operands = 2 : i64, tpu.core_type = #tpu.core_type<tc>, window_params = [{transform_indices = @transform_0, window_bounds = array<i64: 1, 16, 128>}, {pipeline_mode = #tpu.pipeline_mode<synchronous>, transform_indices = @transform_1, window_bounds = array<i64: 128, 384>}, {pipeline_mode = #tpu.pipeline_mode<synchronous>, transform_indices = @transform_2, window_bounds = array<i64: 128, 128>}, {pipeline_mode = #tpu.pipeline_mode<synchronous>, transform_indices = @transform_3, window_bounds = array<i64: 1, 128>}, {transform_indices = @transform_4, window_bounds = array<i64: 1, 16, 128>}]} {
    %c0_i32 = arith.constant 0 : i32
    %0 = arith.cmpi eq, %arg1, %c0_i32 : i32
    %1 = arith.extui %0 : i1 to i32
    %c0_i32_0 = arith.constant 0 : i32
    %2 = arith.cmpi ne, %1, %c0_i32_0 : i32
    scf.if %2 {
      %c0_26 = arith.constant 0 : index
      %c0_27 = arith.constant 0 : index
      %c0_28 = arith.constant 0 : index
      %52 = vector.load %arg2[%c0_26, %c0_27, %c0_28] : memref<1x16x128xbf16, #tpu.memory_space<vmem>>, vector<1x16x128xbf16>
      %53 = vector.shape_cast %52 : vector<1x16x128xbf16> to vector<16x128xbf16>
      %c0_29 = arith.constant 0 : index
      %c0_30 = arith.constant 0 : index
      %54 = vector.load %arg3[%c0_29, %c0_30] : memref<128x384xbf16, #tpu.memory_space<vmem>>, vector<128x384xbf16>
      %cst_31 = arith.constant dense<0.000000e+00> : vector<16x384xf32>
      %55 = tpu.matmul %53, %54, %cst_31 {dimension_numbers = #tpu.dot_dimension_numbers<[1], [0], [0], [1], [0, 0, 1, 1], [], []>} : vector<16x128xbf16>, vector<128x384xbf16>, vector<16x384xf32> -> vector<16x384xf32>
      %56 = arith.truncf %55 : vector<16x384xf32> to vector<16x384xbf16>
      %c0_32 = arith.constant 0 : index
      %c0_33 = arith.constant 0 : index
      %57 = vector.load %arg7[%c0_32, %c0_33] : memref<16x384xbf16, #tpu.memory_space<vmem>>, vector<16x384xbf16>
      tpu.vector_store %arg7[%c0_32, %c0_33], %56 {strides = array<i32>} : memref<16x384xbf16, #tpu.memory_space<vmem>>, vector<16x384xbf16>,
    } else {
    }
    %c16_i32 = arith.constant 16 : i32
    %3 = arith.muli %arg1, %c16_i32 : i32
    %4 = tpu.assume_multiple %3, 16 : i32
    %5 = arith.index_cast %4 : i32 to index
    %c0 = arith.constant 0 : index
    %6 = vector.load %arg7[%5, %c0] : memref<16x384xbf16, #tpu.memory_space<vmem>>, vector<16x64xbf16>
    %c0_1 = arith.constant 0 : index
    %c128 = arith.constant 128 : index
    %7 = vector.load %arg7[%c0_1, %c128] : memref<16x384xbf16, #tpu.memory_space<vmem>>, vector<16x64xbf16>
    %c0_2 = arith.constant 0 : index
    %c256 = arith.constant 256 : index
    %8 = vector.load %arg7[%c0_2, %c256] : memref<16x384xbf16, #tpu.memory_space<vmem>>, vector<16x64xbf16>
    %cst = arith.constant dense<0.000000e+00> : vector<16x16xf32>
    %9 = tpu.matmul %6, %7, %cst {dimension_numbers = #tpu.dot_dimension_numbers<[1], [1], [0], [0], [0, 0, 1, 0], [], []>} : vector<16x64xbf16>, vector<16x64xbf16>, vector<16x16xf32> -> vector<16x16xf32>
    %cst_3 = arith.constant dense<0xFF800000> : vector<16xf32>
    %10 = vector.multi_reduction <maximumf>, %9, %cst_3 [1] : vector<16x16xf32> to vector<16xf32>
    %11 = vector.shape_cast %10 : vector<16xf32> to vector<16x1xf32>
    %12 = vector.broadcast %11 : vector<16x1xf32> to vector<16x16xf32>
    %13 = arith.subf %9, %12 : vector<16x16xf32>
    %14 = math.exp %13 : vector<16x16xf32>
    %cst_4 = arith.constant dense<0.000000e+00> : vector<16xf32>
    %15 = vector.multi_reduction <add>, %14, %cst_4 [1] : vector<16x16xf32> to vector<16xf32>
    %16 = vector.shape_cast %15 : vector<16xf32> to vector<16x1xf32>
    %17 = arith.truncf %14 : vector<16x16xf32> to vector<16x16xbf16>
    %cst_5 = arith.constant dense<0.000000e+00> : vector<16x64xf32>
    %18 = tpu.matmul %17, %8, %cst_5 {dimension_numbers = #tpu.dot_dimension_numbers<[1], [0], [0], [1], [0, 0, 1, 1], [], []>} : vector<16x16xbf16>, vector<16x64xbf16>, vector<16x64xf32> -> vector<16x64xf32>
    %19 = tpu.reciprocal %16 {approx = true} : vector<16x1xf32> -> vector<16x1xf32>
    %20 = vector.broadcast %19 : vector<16x1xf32> to vector<16x64xf32>
    %21 = arith.mulf %18, %20 : vector<16x64xf32>
    %22 = arith.truncf %21 : vector<16x64xf32> to vector<16x64xbf16>
    %c0_6 = arith.constant 0 : index
    %c0_7 = arith.constant 0 : index
    %23 = vector.load %arg8[%c0_6, %c0_7] : memref<16x128xbf16, #tpu.memory_space<vmem>>, vector<16x64xbf16>
    tpu.vector_store %arg8[%c0_6, %c0_7], %22 {strides = array<i32>} : memref<16x128xbf16, #tpu.memory_space<vmem>>, vector<16x64xbf16>,
    %24 = arith.index_cast %4 : i32 to index
    %c64 = arith.constant 64 : index
    %25 = vector.load %arg7[%24, %c64] : memref<16x384xbf16, #tpu.memory_space<vmem>>, vector<16x64xbf16>
    %c0_8 = arith.constant 0 : index
    %c192 = arith.constant 192 : index
    %26 = vector.load %arg7[%c0_8, %c192] : memref<16x384xbf16, #tpu.memory_space<vmem>>, vector<16x64xbf16>
    %c0_9 = arith.constant 0 : index
    %c320 = arith.constant 320 : index
    %27 = vector.load %arg7[%c0_9, %c320] : memref<16x384xbf16, #tpu.memory_space<vmem>>, vector<16x64xbf16>
    %cst_10 = arith.constant dense<0.000000e+00> : vector<16x16xf32>
    %28 = tpu.matmul %25, %26, %cst_10 {dimension_numbers = #tpu.dot_dimension_numbers<[1], [1], [0], [0], [0, 0, 1, 0], [], []>} : vector<16x64xbf16>, vector<16x64xbf16>, vector<16x16xf32> -> vector<16x16xf32>
    %cst_11 = arith.constant dense<0xFF800000> : vector<16xf32>
    %29 = vector.multi_reduction <maximumf>, %28, %cst_11 [1] : vector<16x16xf32> to vector<16xf32>
    %30 = vector.shape_cast %29 : vector<16xf32> to vector<16x1xf32>
    %31 = vector.broadcast %30 : vector<16x1xf32> to vector<16x16xf32>
    %32 = arith.subf %28, %31 : vector<16x16xf32>
    %33 = math.exp %32 : vector<16x16xf32>
    %cst_12 = arith.constant dense<0.000000e+00> : vector<16xf32>
    %34 = vector.multi_reduction <add>, %33, %cst_12 [1] : vector<16x16xf32> to vector<16xf32>
    %35 = vector.shape_cast %34 : vector<16xf32> to vector<16x1xf32>
    %36 = arith.truncf %33 : vector<16x16xf32> to vector<16x16xbf16>
    %cst_13 = arith.constant dense<0.000000e+00> : vector<16x64xf32>
    %37 = tpu.matmul %36, %27, %cst_13 {dimension_numbers = #tpu.dot_dimension_numbers<[1], [0], [0], [1], [0, 0, 1, 1], [], []>} : vector<16x16xbf16>, vector<16x64xbf16>, vector<16x64xf32> -> vector<16x64xf32>
    %38 = tpu.reciprocal %35 {approx = true} : vector<16x1xf32> -> vector<16x1xf32>
    %39 = vector.broadcast %38 : vector<16x1xf32> to vector<16x64xf32>
    %40 = arith.mulf %37, %39 : vector<16x64xf32>
    %41 = arith.truncf %40 : vector<16x64xf32> to vector<16x64xbf16>
    %c0_14 = arith.constant 0 : index
    %c64_15 = arith.constant 64 : index
    %42 = vector.load %arg8[%c0_14, %c64_15] : memref<16x128xbf16, #tpu.memory_space<vmem>>, vector<16x64xbf16>
    tpu.vector_store %arg8[%c0_14, %c64_15], %41 {strides = array<i32>} : memref<16x128xbf16, #tpu.memory_space<vmem>>, vector<16x64xbf16>,
    %c0_16 = arith.constant 0 : index
    %c0_17 = arith.constant 0 : index
    %43 = vector.load %arg8[%c0_16, %c0_17] : memref<16x128xbf16, #tpu.memory_space<vmem>>, vector<16x128xbf16>
    %c0_18 = arith.constant 0 : index
    %c0_19 = arith.constant 0 : index
    %44 = vector.load %arg4[%c0_18, %c0_19] : memref<128x128xbf16, #tpu.memory_space<vmem>>, vector<128x128xbf16>
    %cst_20 = arith.constant dense<0.000000e+00> : vector<16x128xf32>
    %45 = tpu.matmul %43, %44, %cst_20 {dimension_numbers = #tpu.dot_dimension_numbers<[1], [0], [0], [1], [0, 0, 1, 1], [], []>} : vector<16x128xbf16>, vector<128x128xbf16>, vector<16x128xf32> -> vector<16x128xf32>
    %c0_21 = arith.constant 0 : index
    %c0_22 = arith.constant 0 : index
    %46 = vector.load %arg5[%c0_21, %c0_22] : memref<1x128xf32, #tpu.memory_space<vmem>>, vector<1x128xf32>
    %47 = vector.broadcast %46 : vector<1x128xf32> to vector<16x128xf32>
    %48 = arith.addf %45, %47 : vector<16x128xf32>
    %c0_23 = arith.constant 0 : index
    %c0_24 = arith.constant 0 : index
    %c0_25 = arith.constant 0 : index
    %49 = vector.load %arg6[%c0_23, %c0_24, %c0_25] : memref<1x16x128xf32, #tpu.memory_space<vmem>>, vector<1x16x128xf32>
    %50 = vector.shape_cast %49 : vector<1x16x128xf32> to vector<16x128xf32>
    %51 = vector.shape_cast %48 : vector<16x128xf32> to vector<1x16x128xf32>
    tpu.vector_store %arg6[%c0_23, %c0_24, %c0_25], %51 {strides = array<i32>} : memref<1x16x128xf32, #tpu.memory_space<vmem>>, vector<1x16x128xf32>,
    return
  }
  func.func @transform_0(%arg0: i32, %arg1: i32) -> (i32, i32, i32) {
    %c0_i32 = arith.constant 0 : i32
    %c0_i32_0 = arith.constant 0 : i32
    %c0_i32_1 = arith.constant 0 : i32
    return %arg0, %c0_i32, %c0_i32_0 : i32, i32, i32
  }
  func.func @transform_1(%arg0: i32, %arg1: i32) -> (i32, i32) {
    %c0_i32 = arith.constant 0 : i32
    %c0_i32_0 = arith.constant 0 : i32
    %c0_i32_1 = arith.constant 0 : i32
    return %c0_i32, %c0_i32_0 : i32, i32
  }
  func.func @transform_2(%arg0: i32, %arg1: i32) -> (i32, i32) {
    %c0_i32 = arith.constant 0 : i32
    %c0_i32_0 = arith.constant 0 : i32
    %c0_i32_1 = arith.constant 0 : i32
    return %c0_i32, %c0_i32_0 : i32, i32
  }
  func.func @transform_3(%arg0: i32, %arg1: i32) -> (i32, i32) {
    %c0_i32 = arith.constant 0 : i32
    %c0_i32_0 = arith.constant 0 : i32
    %c0_i32_1 = arith.constant 0 : i32
    return %c0_i32, %c0_i32_0 : i32, i32
  }
  func.func @transform_4(%arg0: i32, %arg1: i32) -> (i32, i32, i32) {
    %c0_i32 = arith.constant 0 : i32
    %c0_i32_0 = arith.constant 0 : i32
    return %arg0, %arg1, %c0_i32 : i32, i32, i32
  }
}

</mosaic_0001>

<bundles_post_ra>
// kernel: tpu_custom_call.1
= control target key start
LH: loop header
LB: loop body
LE: loop exit
PB: predicated region body
PF: predicated region fallthrough
CT: control target
= control target key end

     0   :  { %s1622_s0 = inlined_call_operand.hbm [shape: bf16[2,16,128], index: 0, kind: input, shape index: {}]   ;;  %s1623_s1 = inlined_call_operand.hbm [shape: bf16[128,384], index: 1, kind: input, shape index: {}]   ;;  %s1624_s2 = inlined_call_operand.hbm [shape: bf16[128,128], index: 2, kind: input, shape index: {}]   ;;  %s1625_s3 = inlined_call_operand.vmem [shape: f32[1,128], index: 3, kind: input, shape index: {}]   ;;  %s1626_s4 = inlined_call_operand.hbm [shape: f32[2,16,128], index: 4, kind: output, shape index: {}]  }
   0x1   :  { %1628 = sst [smem:[#allocation14_spill]] %s1623_s1 }
   0x2   :  { %9 = vsyncpa [#allocation5], 0 }
   0x3   :  { %11 = vsyncpa [#allocation5 + $0x1], 0 }
   0x4   :  { %12 = vsyncpa [#allocation8], 0 }
   0x5   :  { %13 = vsyncpa [#allocation6], 0 }
   0x6   :  { %15 = vsyncpa [#allocation6 + $0x1], 0  ;;  %s1444_s15 = smov 0   ;;  %s1446_s16 = smov 0  }
   0x7   :  { %s1448_s17 = smov 0   ;;  %s1450_s18 = smov 0  }
   0x8   :  { %s1452_s19 = smov 0   ;;  %s1454_s20 = smov 0  }
   0x9 LB: > { %s900_s21 = sadd.s32 4294967295, %s1408_s20   ;;  %s901_s22 = sadd.s32 4294967294, %s1408_s20   ;;  %s1408_s20 = sphi %s1454_s20, %s21_s20   ;;  %s1404_s19 = sphi %s1452_s19, %s1640_s19   ;;  %s1400_s18 = sphi %s1450_s18, %s1639_s18   ;;  %s1396_s17 = sphi %s1448_s17, %s1638_s17   ;;  %s1392_s16 = sphi %s1446_s16, %s1637_s16   ;;  %s1388_s15 = sphi %s1444_s15, %s1636_s15  }
   0xa   : > { %p53_p0 = scmp.ne.s32.totalorder %s1392_s16, %s1388_s15  ;;  %p1480_p1 = scmp.eq.s32.totalorder %s900_s21, 0 }
   0xb   : > { %p148_p2 = scmp.eq.s32.totalorder %s901_s22, 1  ;;  %p902_p4 = scmp.ge.s32.totalorder %s1408_s20, 1 }
   0xc   : > { %p1486_p3 = por %p1480_p1, %p53_p0  ;;  %p155_p6 = scmp.lt.s32.totalorder %s1408_s20, 3 }
   0xd   : > { %p1491_p5 = por %p148_p2, %p53_p0  ;;  %s1632_s1 = sld [smem:[#allocation14_spill]] }
   0xe   : > { %p1499_p7 = pnand %p902_p4, %p155_p6  ;;  %s1410_s30 = smov [#allocation7]  }
   0xf   : > { %s168_s5 = sshll.u32 %s1410_s30, 4  ;;  %p905_p10 = scmp.ge.s32.totalorder %s1408_s20, 2  ;;  %s169_s5 = int_to_ptr.vmem [resolvable:$true] %s168_s5 }
  0x10   : > { %p1137_p8 = pneg %p1499_p7  ;;  %s180_s8 = sshll.u32 %s1624_s2, 4  ;;  %s181_s8 = int_to_ptr.hbm [resolvable:$true] %s180_s8 }
  0x11   : > { %s1411_s9 = smov 192   ;;  %s1412_s10 = smov 12  }
  0x12   : > { %p1138_p9 = pnand %p1137_p8, %p1480_p1  ;;  %s1413_s11 = smov [#allocation9]  }
  0x13   : > { %s166_s28 = sshll.u32 %s1632_s1, 4  ;;  %s182_s12 = sshll.u32 %s1413_s11, 4  ;;  %s167_s28 = int_to_ptr.hbm [resolvable:$true] %s166_s28  ;;  %s183_s12 = int_to_ptr.vmem [resolvable:$true] %s182_s12 }
  0x14   : > { %1140 = dma.hbm_to_vmem [thread:$0]  (!%p1138_p9), %s167_s28, 3072, %s169_s5, [#allocation8], %s1411_s9, %s1411_s9, %s1412_s10  }
  0x15   : > { %s1627_s13 = smov 64   ;;  %s1415_s14 = smov 4  }
  0x16   : > { %1143 = dma.hbm_to_vmem [thread:$0]  (!%p1138_p9), %s181_s8, 1024, %s183_s12, [#allocation8], %s1627_s13, %s1627_s13, %s1415_s14  }
  0x17   : > { %p142_p11 = scmp.eq.s32.totalorder %s900_s21, 1  ;;  %s33_s22 = sadd.s32 1, %s1404_s19 }
  0x18   : > { %p35_p12 = scmp.ge.s32.totalorder %s33_s22, 2  ;;  %s40_s26 = sadd.s32 1, %s1396_s17 }
  0x19   : > { %p47_p13 = scmp.ne.s32.totalorder %s1396_s17, %s1392_s16  ;;  %p48_p0 = scmp.eq.s32.totalorder %s1408_s20, 0 }
  0x1a   : > { %s1642_s22 = smov (%p35_p12, %s33_s22), 0  ;;  %p1154_p4 = scmp.lt.s32.totalorder %s1408_s20, 2 }
  0x1b   : > { %p1523_p2 = por %p142_p11, %p47_p13  ;;  %s37_s28 = ssub.s32 %s1404_s19, %s1642_s22 }
  0x1c   : > { %s199_s30 = sand.u32 1, %s1396_s17   ;;  %p38_p6 = scmp.eq.s32.totalorder %s37_s28, 0 }
  0x1d   : > { %p49_p8 = por %p48_p0, %p47_p13  ;;  %s906_s5 = sshll.u32 %s199_s30, 3 }
  0x1e   : > { %s1083_s21 = sshll.u32 %s1404_s19, 3  ;;  %s203_s11 = scalar_lea.vmem [#allocation4], %s906_s5 }
  0x1f   : > { %s1533_s6 = scalar_select %p38_p6, %s1396_s17, %s40_s26  }
  0x20   : > { %s208_s9 = scalar_lea.hbm %s1622_s0, %s1083_s21  ;;  %s211_s12 = sshll.u32 %s203_s11, 4  ;;  %s212_s12 = int_to_ptr.vmem [resolvable:$true] %s211_s12 }
  0x21   : > { %s209_s10 = sshll.u32 %s208_s9, 4  ;;  %p1145_p9 = pnand %p1154_p4, %p49_p8  ;;  %s210_s10 = int_to_ptr.hbm [resolvable:$true] %s209_s10 }
  0x22   : > { %s200_s13 = scalar_lea.sflag [#allocation5], %s199_s30  ;;  %s1635_s1 = smov 64  }
  0x23   : > { %1147 = dma.hbm_to_vmem [thread:$0]  (!%p1145_p9), %s210_s10, 128, %s212_s12, %s200_s13, %s1635_s1, %s1635_s1, %s1415_s14  }
  0x24   : > { %223 = sbr.rel (%p1499_p7) target bundleno = 1183 (0x49f), region = 36  ;;  %s1546_s26 = sand.u32 (!%p1499_p7), 1, %s1392_s16  }
  0x25   : > { %s910_s28 = sshll.u32 (!%p1499_p7), %s1546_s26, 3  ;;  %s226_s5 = scalar_lea.sflag (!%p1499_p7), [#allocation5], %s1546_s26 }
  0x26   : > { %s1550_s21 = scalar_lea.vmem (!%p1499_p7), [#allocation4], %s910_s28 }
  0x29   : > { %1375 = dma.done.wait (%p1486_p3), %s226_s5, 128  }
  0x2a   : > { %1377 = vsyncadd (%p1486_p3), %s226_s5, 4294967168 }
  0x2b   : > { %1379 = dma.done.wait (%p1480_p1), [#allocation8], 4096  }
  0x2c   : > { %1381 = vsyncadd (%p1480_p1), [#allocation8], 4294963200  ;;  %v1004_v0 = vld [vmem:[#allocation7 + $0xa8] sm:$0xf]  ;;  %v1107_v1 = vld [vmem:[#allocation7 + $0xb0] sm:$0xf0] }
  0x2d   : > { %v1106_v2 = vld [vmem:[#allocation7 + $0xac] sm:$0xf]  ;;  %v1005_v3 = vor.u32 %v1107_v1, %v1004_v0  ;;  %v1006_v4 = vld [vmem:[#allocation7 + $0xb4] sm:$0xf0]  ;;  %v992_v5 = vld [vmem:[#allocation7 + $0x90] sm:$0xf] }
  0x2e   : > { %v1104_v6 = vld [vmem:[#allocation7 + $0x98] sm:$0xf0]  ;;  %v1009_v7 = vor.u32 %v1106_v2, %v1006_v4  ;;  %v1103_v8 = vld [vmem:[#allocation7 + $0x94] sm:$0xf]  ;;  %v994_v9 = vld [vmem:[#allocation7 + $0x9c] sm:$0xf0] }
  0x2f   : > { %439 = vmatpush.bf16.msra.mxu0 %v1005_v3  ;;  %v993_v10 = vor.u32 %v1104_v6, %v992_v5  ;;  %v997_v11 = vor.u32 %v1103_v8, %v994_v9  ;;  %v980_v12 = vld [vmem:[#allocation7 + $0x78] sm:$0xf]  ;;  %v1101_v13 = vld [vmem:[#allocation7 + $0x80] sm:$0xf0]  ;;  %v1100_v14 = vld [vmem:[#allocation7 + $0x7c] sm:$0xf] }
  0x30   : > { %453 = vmatpush.bf16.msra.mxu1 %v1009_v7  ;;  %v982_v15 = vld [vmem:[#allocation7 + $0x84] sm:$0xf0]  ;;  %v981_v16 = vor.u32 %v1101_v13, %v980_v12  ;;  %v968_v18 = vld [vmem:[#allocation7 + $0x60] sm:$0xf]  ;;  %v1098_v19 = vld [vmem:[#allocation7 + $0x68] sm:$0xf0] }
  0x31   : > { %v985_v17 = vor.u32 %v1100_v14, %v982_v15  ;;  %v1097_v20 = vld [vmem:[#allocation7 + $0x64] sm:$0xf]  ;;  %v970_v21 = vld [vmem:[#allocation7 + $0x6c] sm:$0xf0]  ;;  %v969_v22 = vor.u32 %v1098_v19, %v968_v18  ;;  %v1108_v24 = vld [vmem:[#allocation7 + $0xb8] sm:$0xf0] }
  0x32   : > { %v1012_v23 = vld [vmem:[#allocation7 + $0xb0] sm:$0xf]  ;;  %v1000_v25 = vld [vmem:[#allocation7 + $0x98] sm:$0xf]  ;;  %v973_v26 = vor.u32 %v1097_v20, %v970_v21  ;;  %v956_v27 = vld [vmem:[#allocation7 + $0x48] sm:$0xf] }
  0x33   : > { %440 = vmatpush.bf16.msra.mxu0 %v993_v10  ;;  %v1095_v28 = vld [vmem:[#allocation7 + $0x50] sm:$0xf0]  ;;  %v1013_v29 = vor.u32 %v1108_v24, %v1012_v23  ;;  %v1105_v30 = vld [vmem:[#allocation7 + $0xa0] sm:$0xf0]  ;;  %v1094_v31 = vld [vmem:[#allocation7 + $0x4c] sm:$0xf] }
  0x34   : > { %454 = vmatpush.bf16.msra.mxu1 %v997_v11  ;;  %v958_v32 = vld [vmem:[#allocation7 + $0x54] sm:$0xf0]  ;;  %v1001_v33 = vor.u32 %v1105_v30, %v1000_v25  ;;  %v957_v34 = vor.u32 %v1095_v28, %v956_v27  ;;  %v988_v35 = vld [vmem:[#allocation7 + $0x80] sm:$0xf]  ;;  %v1102_v36 = vld [vmem:[#allocation7 + $0x88] sm:$0xf0] }
  0x35   : > { %467 = vmatpush.bf16.msra.mxu2 %v1013_v29  ;;  %v961_v37 = vor.u32 %v1094_v31, %v958_v32  ;;  %v944_v38 = vld [vmem:[#allocation7 + $0x30] sm:$0xf]  ;;  %v1092_v39 = vld [vmem:[#allocation7 + $0x38] sm:$0xf0]  ;;  %v1091_v40 = vld [vmem:[#allocation7 + $0x34] sm:$0xf]  ;;  %v989_v42 = vor.u32 %v1102_v36, %v988_v35 }
  0x36   : > { %v946_v41 = vld [vmem:[#allocation7 + $0x3c] sm:$0xf0]  ;;  %v945_v43 = vor.u32 %v1092_v39, %v944_v38  ;;  %v976_v44 = vld [vmem:[#allocation7 + $0x68] sm:$0xf]  ;;  %v1099_v45 = vld [vmem:[#allocation7 + $0x70] sm:$0xf0] }
  0x37   : > { %441 = vmatpush.bf16.msra.mxu0 %v981_v16  ;;  %v949_v46 = vor.u32 %v1091_v40, %v946_v41  ;;  %v932_v47 = vld [vmem:[#allocation7 + $0x18] sm:$0xf]  ;;  %v1089_v48 = vld [vmem:[#allocation7 + $0x20] sm:$0xf0]  ;;  %v1088_v49 = vld [vmem:[#allocation7 + $0x1c] sm:$0xf]  ;;  %v977_v51 = vor.u32 %v1099_v45, %v976_v44 }
  0x38   : > { %455 = vmatpush.bf16.msra.mxu1 %v985_v17  ;;  %v934_v50 = vld [vmem:[#allocation7 + $0x24] sm:$0xf0]  ;;  %v933_v52 = vor.u32 %v1089_v48, %v932_v47  ;;  %v964_v53 = vld [vmem:[#allocation7 + $0x50] sm:$0xf]  ;;  %v1096_v54 = vld [vmem:[#allocation7 + $0x58] sm:$0xf0] }
  0x39   : > { %468 = vmatpush.bf16.msra.mxu2 %v1001_v33  ;;  %v937_v55 = vor.u32 %v1088_v49, %v934_v50  ;;  %v920_v56 = vld [vmem:[#allocation7] sm:$0xf]  ;;  %v1086_v57 = vld [vmem:[#allocation7 + $0x8] sm:$0xf0]  ;;  %v1085_v58 = vld [vmem:[#allocation7 + $0x4] sm:$0xf]  ;;  %v965_v60 = vor.u32 %v1096_v54, %v964_v53 }
  0x3a   : > { %v922_v59 = vld [vmem:[#allocation7 + $0xc] sm:$0xf0]  ;;  %v921_v61 = vor.u32 %v1086_v57, %v920_v56  ;;  %v952_v62 = vld [vmem:[#allocation7 + $0x38] sm:$0xf]  ;;  %v1093_v63 = vld [vmem:[#allocation7 + $0x40] sm:$0xf0] }
  0x3b   : > { %442 = vmatpush.bf16.msra.mxu0 %v969_v22  ;;  %v925_v0 = vor.u32 %v1085_v58, %v922_v59  ;;  %v1084_v1 = vld [vmem:[%s1550_s21] sm:$0xff]  ;;  %v953_v2 = vor.u32 %v1093_v63, %v952_v62  ;;  %v940_v3 = vld [vmem:[#allocation7 + $0x20] sm:$0xf]  ;;  %v1090_v4 = vld [vmem:[#allocation7 + $0x28] sm:$0xf0]  ;;  %vm511_vm0 = vcmask 523264  }
  0x3c   : > { %456 = vmatpush.bf16.msra.mxu1 %v973_v26  ;;  %v941_v5 = vor.u32 %v1090_v4, %v940_v3  ;;  %v928_v6 = vld [vmem:[#allocation7 + $0x8] sm:$0xf]  ;;  %v1087_v7 = vld [vmem:[#allocation7 + $0x10] sm:$0xf0]  ;;  %s1416_s1 = smov 64   ;;  %vm532_vm1 = vcmask 130048  }
  0x3d   : > { %469 = vmatpush.bf16.msra.mxu2 %v989_v42  ;;  %v929_v8 = vor.u32 %v1087_v7, %v928_v6  ;;  %vm581_vm2 = vcmask 519168   ;;  %vm682_vm3 = vcmask 1043968   ;;  %s913_s23 = sshll.u32 %s1546_s26, 4  ;;  %s1124_s13 = sshll.u32 %s1400_s18, 4 }
  0x3e   : > { %s791_s7 = scalar_lea.hbm %s1626_s4, %s1124_s13  ;;  %s264_s8 = scalar_lea.vmem [#allocation10], %s913_s23 }
  0x3f   : > { %443 = vmatpush.bf16.msra.mxu0 %v957_v34  ;;  %s792_s9 = sshll.u32 %s264_s8, 4  ;;  %s794_s10 = sshll.u32 %s791_s7, 4  ;;  %s793_s9 = int_to_ptr.vmem [resolvable:$true] %s792_s9  ;;  %s795_s10 = int_to_ptr.hbm [resolvable:$true] %s794_s10 }
  0x40   : > { %457 = vmatpush.bf16.msra.mxu1 %v961_v37  ;;  %s778_s11 = scalar_lea.sflag [#allocation6], %s1546_s26  ;;  %s1336_s12 = sshra.s32 %s795_s10, 4  ;;  %s1337_s12 = int_to_ptr.hbm [resolvable:$true] %s1336_s12 }
  0x41   : > { %470 = vmatpush.bf16.msra.mxu2 %v977_v51  ;;  %s1338_s18 = scalar_lea.hbm %s1337_s12, 16  ;;  %s1342_s21 = scalar_lea.hbm %s1626_s4, 32 }
  0x42   : > { %p1339_p1 = scmp.ne.s32.totalorder %s1337_s12, %s1338_s18  ;;  %p1343_p11 = scmp.lt.s32.totalorder %s1337_s12, %s1626_s4 }
  0x43   : > { %444 = vmatpush.bf16.msra.mxu0 %v945_v43  ;;  %p1344_p12 = scmp.lt.s32.totalorder %s1342_s21, %s1338_s18 }
  0x44   : > { %458 = vmatpush.bf16.msra.mxu1 %v949_v46  ;;  %p1340_p3 = pnand %p1339_p1, %p1523_p2 }
  0x45   : > { %471 = vmatpush.bf16.msra.mxu2 %v965_v60  ;;  %p1345_p13 = por %p1344_p12, %p1343_p11 }
  0x46   : > { %p1341_p7 = pneg %p1340_p3 }
  0x47   : > { %445 = vmatpush.bf16.msra.mxu0 %v933_v52 }
  0x48   : > { %459 = vmatpush.bf16.msra.mxu1 %v937_v55  ;;  %p1346_p0 = pnand %p1345_p13, %p1341_p7 }
  0x49   : > { %472 = vmatpush.bf16.msra.mxu2 %v953_v2 }
  0x4b   : > { %446 = vmatpush.bf16.msra.mxu0 %v921_v61 }
  0x4c   : > { %460 = vmatpush.bf16.msra.mxu1 %v925_v0 }
  0x4d   : > { %473 = vmatpush.bf16.msra.mxu2 %v941_v5 }
  0x4e   : > { %447 = vmatmul.bf16.vlgmr.msra.gmra.mxu0 %v1084_v1 }
  0x4f   : > { %461 = vmatmul.bf16.vlgmr.msra.gmra.mxu1 %v1084_v1 }
  0x51   : > { %474 = vmatpush.bf16.msra.mxu2 %v929_v8 }
  0x54   : > { %475 = vmatmul.bf16.vlgmr.msra.gmra.mxu2 %v1084_v1 }
  0xcb   : > { %v448_v9 = vpop.f32.mrf.mxu0 }
  0xcc   : > { %v462_v10 = vpop.f32.mrf.mxu1 }
  0xcd   : > { %v481_v11 = vpack.c.bf16 %v462_v10, %v448_v9  ;;  %v1123_v10 = vld [vmem:[#allocation9 + $0x38] sm:$0xff] }
  0xce   : > { %761 = vmatpush.bf16.msrb.mxu1 %v1123_v10 }
  0xcf   : > { %485 = vst [vmem:[#allocation2] sm:$0xff] %v481_v11  ;;  %v1122_v11 = vld [vmem:[#allocation9 + $0x30] sm:$0xff] }
  0xd2   : > { %762 = vmatpush.bf16.msrb.mxu1 %v1122_v11 }
  0xd3   : > { %v450_v12 = vpop.f32.mrf.mxu0 }
  0xd4   : > { %v464_v13 = vpop.f32.mrf.mxu1 }
  0xd5   : > { %v483_v14 = vpack.c.bf16 %v464_v13, %v450_v12 }
  0xd6   : > { %v1034_v16 = vld [vmem:[#allocation2 + $0x4] sm:$0xf]  ;;  %v1030_v28 = vld [vmem:[#allocation2] sm:$0xf] }
  0xd7   : > { %487 = vst [vmem:[#allocation2 + $0xc] sm:$0xff] %v483_v14  ;;  %v476_v15 = vpop.f32.mrf.mxu2  ;;  %v1020_v19 = vld [vmem:[#allocation2 + $0x4] sm:$0xf]  ;;  %v1016_v29 = vld [vmem:[#allocation2] sm:$0xf] }
  0xd8   : > { %v482_v17 = vpack.c.bf16 %v476_v15, %v476_v15 }
  0xda   : > { %486 = vst [vmem:[#allocation2 + $0x8] sm:$0xf] %v482_v17 }
  0xde   : > { %v1113_v18 = vld [vmem:[#allocation2 + $0xc] sm:$0xf0]  ;;  %v1112_v24 = vld [vmem:[#allocation2 + $0x8] sm:$0xf0] }
  0xdf   : > { %v1110_v20 = vld [vmem:[#allocation2 + $0xc] sm:$0xf0]  ;;  %v1035_v21 = vor.u32 %v1113_v18, %v1034_v16  ;;  %v1109_v25 = vld [vmem:[#allocation2 + $0x8] sm:$0xf0]  ;;  %v478_v26 = vpop.f32.mrf.mxu2  ;;  %v1031_v30 = vor.u32 %v1112_v24, %v1030_v28 }
  0xe0   : > { %v1021_v22 = vor.u32 %v1110_v20, %v1020_v19  ;;  %v484_v27 = vpack.c.bf16 %v478_v26, %v478_v26  ;;  %v1017_v31 = vor.u32 %v1109_v25, %v1016_v29 }
  0xe1   : > { %602 = vrot.lane.b32.xlu1 %v1035_v21, %s1416_s1  ;;  %v1025_v32 = vld [vmem:[#allocation2 + $0x8] sm:$0xf] }
  0xe2   : > { %v516_v23 = vsel %vm511_vm0, %v1021_v22, 0  ;;  %488 = vst [vmem:[#allocation2 + $0x14] sm:$0xf] %v484_v27  ;;  %v1039_v41 = vld [vmem:[#allocation2 + $0x8] sm:$0xf] }
  0xe3   : > { %525 = vmatpush.bf16.xpose.msra.mxu3 %v516_v23 }
  0xe9   : > { %595 = vrot.lane.b32.xlu1 %v1031_v30, %s1416_s1  ;;  %v1111_v33 = vld [vmem:[#allocation2 + $0x10] sm:$0xf0]  ;;  %v1121_v30 = vld [vmem:[#allocation9 + $0x28] sm:$0xff] }
  0xea   : > { %1022 = vmatmul.msk.bf16.vlgmr.msra.gmra.mxu3 %vm511_vm0, %v1017_v31  ;;  %v1026_v34 = vor.u32 %v1111_v33, %v1025_v32  ;;  %v1114_v42 = vld [vmem:[#allocation2 + $0x10] sm:$0xf0]  ;;  %763 = vmatpush.bf16.msrb.mxu1 %v1121_v30  ;;  %v1119_v32 = vld [vmem:[#allocation9 + $0x18] sm:$0xff]  ;;  %v1118_v33 = vld [vmem:[#allocation9 + $0x10] sm:$0xff] }
  0xeb   : > { %v1040_v43 = vor.u32 %v1114_v42, %v1039_v41  ;;  %v1120_v31 = vld [vmem:[#allocation9 + $0x20] sm:$0xff] }
  0xec   : > { %568 = vmatpush.bf16.msrb.mxu3 %v1026_v34  ;;  %v1117_v34 = vld [vmem:[#allocation9 + $0x8] sm:$0xff] }
  0xee   : > { %764 = vmatpush.bf16.msrb.mxu1 %v1120_v31 }
  0xf2   : > { %765 = vmatpush.bf16.msrb.mxu1 %v1119_v32 }
  0xf6   : > { %766 = vmatpush.bf16.msrb.mxu1 %v1118_v33 }
  0xfa   : > { %767 = vmatpush.bf16.msrb.mxu1 %v1117_v34 }
 0x153   : > { %v603_v35 = vpop.permute.xlu1 %602 }
 0x154   : > { %v608_v36 = vsel %vm511_vm0, %v603_v35, 0  ;;  %v1116_v35 = vld [vmem:[#allocation9] sm:$0xff] }
 0x155   : > { %617 = vmatpush.bf16.xpose.msra.mxu3 %v608_v36  ;;  %768 = vmatpush.bf16.msrb.mxu1 %v1116_v35 }
 0x15b   : > { %v596_v54 = vpop.permute.xlu1 %595 }
 0x16d   : > { %v527_v37 = vpop.f32.mrf.mxu3 }
 0x16e   : > { %v533_v38 = vsel %vm532_vm1, %v527_v37, -inf }
 0x16f   : > { %534 = vmax.xlane.f32.xlu0 %v533_v38 }
 0x175   : > { %v529_v39 = vpop.f32.mrf.mxu3 }
 0x176   : > { %v536_v40 = vsel %vm532_vm1, %v529_v39, -inf }
 0x177   : > { %537 = vmax.xlane.f32.xlu0 %v536_v40 }
 0x18b   : > { %648 = vrot.lane.b32.xlu0 %v1040_v43, %s1416_s1 }
 0x1e2   : > { %v535_v44 = vpop.xlane.xlu0 %534 }
 0x1e3   : > { %v539_v45 = vsub.f32 %v527_v37, %v535_v44 }
 0x1e5   : > { %v541_v46 = vmul.f32 1.442695, %v539_v45 }
 0x1e7   : > { %1216 = vpow2.f32 %v541_v46 }
 0x1ea   : > { %v538_v47 = vpop.xlane.xlu0 %537 }
 0x1eb   : > { %v540_v48 = vsub.f32 %v529_v39, %v538_v47  ;;  %v1215_v39 = vld [vmem:[%s1625_s3] ss:$0 sm:$0xff] }
 0x1ed   : > { %v543_v49 = vmul.f32 1.442695, %v540_v48  ;;  %v1217_v50 = vpop.eup %1216 }
 0x1ee   : > { %v545_v8 = vsel %vm532_vm1, %v1217_v50, 0.0 }
 0x1ef   : > { %1218 = vpow2.f32 %v543_v49 }
 0x1f5   : > { %v1219_v51 = vpop.eup %1218 }
 0x1f6   : > { %v551_v52 = vpack.c.bf16 %v1219_v51, %v1217_v50  ;;  %v548_v9 = vsel %vm532_vm1, %v1219_v51, 0.0 }
 0x1f8   : > { %1027 = vmatmul.msk.bf16.vlgmr.msrb.gmra.mxu3 %vm532_vm1, %v551_v52 }
 0x1fd   : > { %v649_v53 = vpop.permute.xlu0 %648 }
 0x1fe   : > { %661 = vmatpush.bf16.msrb.mxu0 %v649_v53 }
 0x208   : > { %1036 = vmatmul.msk.bf16.vlgmr.msra.gmra.mxu3 %vm511_vm0, %v596_v54 }
 0x27b   : > { %v570_v55 = vpop.f32.mrf.mxu3 }
 0x283   : > { %v572_v56 = vpop.f32.mrf.mxu3 }
 0x28b   : > { %v619_v57 = vpop.f32.mrf.mxu3 }
 0x28c   : > { %v624_v58 = vsel %vm532_vm1, %v619_v57, -inf }
 0x28d   : > { %625 = vmax.xlane.f32.xlu2 %v624_v58 }
 0x293   : > { %v621_v59 = vpop.f32.mrf.mxu3 }
 0x294   : > { %v627_v60 = vsel %vm532_vm1, %v621_v59, -inf }
 0x295   : > { %628 = vmax.xlane.f32.xlu2 %v627_v60 }
 0x300   : > { %v626_v61 = vpop.xlane.xlu2 %625 }
 0x301   : > { %v630_v62 = vsub.f32 %v619_v57, %v626_v61 }
 0x303   : > { %v632_v63 = vmul.f32 1.442695, %v630_v62 }
 0x305   : > { %1220 = vpow2.f32 %v632_v63 }
 0x308   : > { %v629_v0 = vpop.xlane.xlu2 %628 }
 0x309   : > { %v631_v1 = vsub.f32 %v621_v59, %v629_v0 }
 0x30b   : > { %v1221_v2 = vpop.eup %1220  ;;  %v634_v3 = vmul.f32 1.442695, %v631_v1 }
 0x30c   : > { %v636_v4 = vsel %vm532_vm1, %v1221_v2, 0.0 }
 0x30d   : > { %1222 = vpow2.f32 %v634_v3  ;;  %637 = vadd.xlane.f32.xlu1 %v636_v4 }
 0x313   : > { %v1223_v5 = vpop.eup %1222 }
 0x314   : > { %v639_v6 = vsel %vm532_vm1, %v1223_v5, 0.0  ;;  %v642_v7 = vpack.c.bf16 %v1223_v5, %v1221_v2 }
 0x315   : > { %640 = vadd.xlane.f32.xlu2 %v639_v6 }
 0x316   : > { %1041 = vmatmul.msk.bf16.vlgmr.msrb.gmra.mxu0 %vm532_vm1, %v642_v7 }
 0x31d   : > { %546 = vadd.xlane.f32.xlu2 %v545_v8 }
 0x325   : > { %549 = vadd.xlane.f32.xlu2 %v548_v9 }
 0x380   : > { %v638_v13 = vpop.xlane.xlu1 %637 }
 0x381   : > { %1224 = vrcp.f32 %v638_v13 }
 0x387   : > { %v1225_v15 = vpop.eup %1224 }
 0x388   : > { %v641_v12 = vpop.xlane.xlu2 %640 }
 0x390   : > { %v547_v14 = vpop.xlane.xlu2 %546 }
 0x391   : > { %1226 = vrcp.f32 %v547_v14 }
 0x392   : > { %1228 = vrcp.f32 %v641_v12 }
 0x393   : > { %v663_v16 = vpop.f32.mrf.mxu0 }
 0x394   : > { %v670_v17 = vmul.f32 %v1225_v15, %v663_v16 }
 0x396   : > { %v672_v18 = vpack.c.bf16 %v670_v17, %v670_v17 }
 0x397   : > { %v1227_v19 = vpop.eup %1226 }
 0x398   : > { %v577_v20 = vmul.f32 %v1227_v19, %v570_v55  ;;  %v550_v21 = vpop.xlane.xlu2 %549  ;;  %676 = vrot.lane.b32.xlu0 %v672_v18, %s1416_s1  ;;  %v1229_v23 = vpop.eup %1228 }
 0x399   : > { %1230 = vrcp.f32 %v550_v21 }
 0x39a   : > { %v579_v22 = vpack.c.bf16 %v577_v20, %v577_v20 }
 0x39b   : > { %v665_v24 = vpop.f32.mrf.mxu0 }
 0x39c   : > { %v671_v25 = vmul.f32 %v1229_v23, %v665_v24  ;;  %582 = vst.msk [vmem:[#allocation3] sm:$0xf] %vm581_vm2, %v579_v22 }
 0x39e   : > { %v673_v26 = vpack.c.bf16 %v671_v25, %v671_v25 }
 0x39f   : > { %v1231_v27 = vpop.eup %1230 }
 0x3a0   : > { %v578_v28 = vmul.f32 %v1231_v27, %v572_v56  ;;  %678 = vrot.lane.b32.xlu2 %v673_v26, %s1416_s1 }
 0x3a2   : > { %v580_v29 = vpack.c.bf16 %v578_v28, %v578_v28 }
 0x3a4   : > { %583 = vst.msk [vmem:[#allocation3 + $0x4] sm:$0xf] %vm581_vm2, %v580_v29 }
 0x3fa   : > { %v679_v36 = vpop.permute.xlu2 %678 }
 0x3fb   : > { %684 = vst.msk [vmem:[#allocation3 + $0x4] sm:$0xf] %vm682_vm3, %v679_v36 }
 0x40a   : > { %v677_v37 = vpop.permute.xlu0 %676 }
 0x40b   : > { %683 = vst.msk [vmem:[#allocation3] sm:$0xf] %vm682_vm3, %v677_v37 }
 0x412   : > { %v1115_v38 = vld [vmem:[#allocation3] sm:$0xff] }
 0x413   : > { %769 = vmatmul.bf16.vlgmr.msrb.gmra.mxu1 %v1115_v38 }
 0x490   : > { %v770_v40 = vpop.f32.mrf.mxu1 }
 0x491   : > { %v771_v41 = vadd.f32 %v1215_v39, %v770_v40 }
 0x493   : > { %775 = vst [vmem:[%s264_s8] sm:$0xff] %v771_v41 }
 0x498   : > { %v772_v42 = vpop.f32.mrf.mxu1 }
 0x499   : > { %v773_v43 = vadd.f32 %v1215_v39, %v772_v42 }
 0x49b   : > { %776 = vst [vmem:[%s264_s8 + $0x8] sm:$0xff] %v773_v43 }
 0x49c   : > { %1349 = shalt.err (!%p1346_p0)
}
 0x49d   : > { %s1417_s26 = smov 128   ;;  %s1418_s24 = smov 8  }
 0x49e   : > { %1135 = dma.vmem_to_hbm [thread:$0]  (%p1523_p2), %s793_s9, 256, %s795_s10, %s778_s11, %s1417_s26, %s1417_s26, %s1418_s24  }
 0x49f PF: > { %s809_s29 = sand.u32 1, %s1388_s15   ;;  %p1149_p4 = pnand %p905_p10, %p1491_p5 }
 0x4a0   : > { %s810_s13 = scalar_lea.sflag [#allocation6], %s809_s29 }
 0x4a1   : > { %p1150_p6 = pneg %p1149_p4 }
 0x4a3   : > { %1383 = dma.done.wait (%p1150_p6), %s810_s13, 256  }
 0x4a4   : > { %1385 = vsyncadd (%p1150_p6), %s810_s13, 4294967040  ;;  %s21_s20 = sadd.s32 1, %s1408_s20   ;;  %s1636_s15 = smov %s1392_s16 }
 0x4a5   : > { %p18_p8 = scmp.ge.s32.totalorder %s21_s20, 4   ;;  %s1637_s16 = smov %s1396_s17 }
 0x4a6   : > { %s1638_s17 = smov %s1533_s6  ;;  %s1639_s18 = smov %s1404_s19 }
 0x4a7   : > { %s1640_s19 = smov %s1642_s22  ;;  %20 = sbr.rel (!%p18_p8) target bundleno = 9 (0x9), region = 94 }
 0x4ac   :  { %816 = vsyncpa [#allocation5], 1 }
 0x4ad   :  { %818 = vsyncpa [#allocation5 + $0x1], 1 }
 0x4ae   :  { %819 = vsyncpa [#allocation8], 1 }
 0x4af   :  { %820 = vsyncpa [#allocation6], 1 }
 0x4b0   :  { %822 = vsyncpa [#allocation6 + $0x1], 1 }

</bundles_post_ra>
